<compile_context>
chip_gen: v6e
topology: v6e:2x2x1
jax: 0.10.0
libtpu: 0.0.40
codegen_flags: <defaults>
</compile_context>

<pallas_src>
import numpy as np
import jax
import jax.numpy as jnp
from jax.experimental import pallas as pl
from jax.experimental.pallas import tpu as pltpu


def _ffn_kernel(x_ref, w1_ref, b1_ref, w2_ref, b2_ref, o_ref, acc_ref):
    """One (row-tile, d_ff-chunk) step of  y = relu(x @ W1t + b1) @ W2t + b2."""
    k = pl.program_id(1)

    @pl.when(k == 0)
    def _():
        # Seed the f32 accumulator with the output bias (saves an epilogue add).
        acc_ref[...] = jnp.broadcast_to(b2_ref[...], acc_ref.shape)

    # ReLU distributes over the d_ff split: relu(x @ W1t[:, k] + b1[k]) is the
    # k-th chunk of the full hidden vector, so summing chunk @ W2t[k, :] over k
    # reproduces the unchunked result exactly.
    h = jnp.dot(x_ref[...], w1_ref[...], preferred_element_type=jnp.float32)
    h = jnp.maximum(h + b1_ref[...], 0.0)                       # bias + ReLU in f32
    acc_ref[...] += jnp.dot(h.astype(w2_ref.dtype), w2_ref[...],
                            preferred_element_type=jnp.float32)

    @pl.when(k == pl.num_programs(1) - 1)
    def _():
        o_ref[...] = acc_ref[...].astype(o_ref.dtype)


def prepare_ffn_params(params, compute_dtype=jnp.bfloat16):
    """One-time weight prep, hoisted out of the per-call path.

    Conv1d(k=1) == per-position Linear; pre-transpose so the kernel computes a
    plain x @ W (no in-kernel transposes) and cast the weights to the MXU
    operand dtype once.  Biases stay f32 (the accumulation dtype), laid out as
    lane-aligned (1, d) rows.
    """
    d_ff, d_model = params["conv1_w"].shape[0], params["conv1_w"].shape[1]
    return {
        "w1t": jnp.asarray(params["conv1_w"]).reshape(d_ff, d_model).T
               .astype(compute_dtype),                              # (d_model, d_ff)
        "b1": jnp.asarray(params["conv1_b"]).reshape(1, d_ff).astype(jnp.float32),
        "w2t": jnp.asarray(params["conv2_w"]).reshape(d_model, d_ff).T
               .astype(compute_dtype),                              # (d_ff, d_model)
        "b2": jnp.asarray(params["conv2_b"]).reshape(1, d_model).astype(jnp.float32),
    }


def _choose_tm(M, block_rows, row_mult):
    """Row-tile size: multiple of `row_mult` (sublane packing), prefers dividing
    M exactly (no pad/slice HBM passes) and >= 2 row tiles when M is large
    enough to shard across v7x's two TensorCores."""
    if M <= row_mult:
        return M                                          # single full-extent block
    cap = max(row_mult, min((block_rows // row_mult) * row_mult, M))
    if M >= 512:                                          # leave >= 2 steps for megacore
        half = pl.cdiv(pl.cdiv(M, 2), row_mult) * row_mult
        cap = min(cap, half)
    start = (cap // row_mult) * row_mult
    for tm in range(start, row_mult - 1, -row_mult):
        if M % tm == 0:
            return tm
    if M <= block_rows:
        return M                                          # full-extent block, no pad
    return start                                          # ragged tail -> pad + slice


def _choose_tk(d_ff, block_k):
    """d_ff-chunk size: multiple of 128 dividing d_ff (lane-aligned weight
    tiles), capped near block_k; falls back to the full d_ff."""
    if d_ff <= block_k or d_ff % 128 != 0:
        return d_ff
    tk = max(128, (block_k // 128) * 128)
    while d_ff % tk != 0:
        tk -= 128
    return tk


def poswise_ffn(x, prepared, *, block_rows=512, block_k=512, out_dtype=None):
    """Pallas position-wise FFN matching the PyTorch module forward.

    x: (N, L, d_model); prepared: output of prepare_ffn_params().
    MXU operands use prepared['w1t'].dtype (bf16 by default); accumulation,
    biases and ReLU stay f32.  out_dtype=bf16 halves the output store stream.
    """
    N, L, d_model = x.shape
    w1t, b1, w2t, b2 = prepared["w1t"], prepared["b1"], prepared["w2t"], prepared["b2"]
    d_ff = w1t.shape[1]
    cdt = w1t.dtype
    odt = x.dtype if out_dtype is None else out_dtype

    # Collapse (batch, seq) into one fat M dim -> two big matmuls per step.
    M = N * L
    x2 = x.reshape(M, d_model).astype(cdt)

    row_mult = 8 if (jnp.dtype(cdt).itemsize >= 4 and jnp.dtype(odt).itemsize >= 4) else 16
    tm = _choose_tm(M, block_rows, row_mult)
    tk = _choose_tk(d_ff, block_k)
    rt = pl.cdiv(M, tm)
    kt = d_ff // tk
    m_pad = rt * tm
    padded = m_pad != M
    if padded:
        # Padded rows compute relu(b1) @ W2t + b2 (garbage); the out[:M] slice
        # below removes them - do not drop that slice.
        x2 = jnp.pad(x2, ((0, m_pad - M), (0, 0)))

    # VMEM budget: x/out tiles double-buffered, f32 accumulator, weight chunks
    # (single copy when fully resident, double-buffered when streamed), biases.
    isz = jnp.dtype(cdt).itemsize
    vmem_bytes = int(
        2 * tm * d_model * isz
        + 2 * tm * d_model * jnp.dtype(odt).itemsize
        + tm * d_model * 4
        + (1 if kt == 1 else 2) * (d_model * tk + tk * d_model) * isz
        + 2 * 8 * (tk + d_model) * 4
    )
    vmem_limit = min(max(int(vmem_bytes * 1.5) + (4 << 20), 16 << 20), 64 << 20)

    cost = pl.CostEstimate(
        flops=4 * M * d_model * d_ff,
        transcendentals=0,
        bytes_accessed=int(x2.size * isz
                           + m_pad * d_model * jnp.dtype(odt).itemsize
                           + (w1t.size + w2t.size) * isz
                           + (b1.size + b2.size) * 4),
    )

    def run(use_pipeline_mode):
        def bs(shape, idx, buf=None):
            kw = ({"pipeline_mode": pl.Buffered(buf)}
                  if (use_pipeline_mode and buf is not None) else {})
            return pl.BlockSpec(shape, idx, **kw)

        # Single-buffer operands whose block index never changes (halves their
        # resident VMEM); streamed d_ff chunks keep default double-buffering.
        w_buf = 1 if kt == 1 else None
        grid_spec = pltpu.PrefetchScalarGridSpec(
            num_scalar_prefetch=0,
            grid=(rt, kt),
            in_specs=[
                bs((tm, d_model), lambda i, k: (i, 0)),            # x row tile
                bs((d_model, tk), lambda i, k: (0, k), w_buf),     # W1^T chunk
                bs((1, tk), lambda i, k: (0, k), w_buf),           # b1 chunk
                bs((tk, d_model), lambda i, k: (k, 0), w_buf),     # W2^T chunk
                bs((1, d_model), lambda i, k: (0, 0), 1),          # b2 (resident)
            ],
            out_specs=pl.BlockSpec((tm, d_model), lambda i, k: (i, 0)),
            scratch_shapes=[pltpu.VMEM((tm, d_model), jnp.float32)],
        )
        return pl.pallas_call(
            _ffn_kernel,
            out_shape=jax.ShapeDtypeStruct((m_pad, d_model), odt),
            grid_spec=grid_spec,
            compiler_params=pltpu.CompilerParams(
                # Row tiles are independent -> shard across v7x TCs; the d_ff
                # axis is a reduction into the accumulator -> arbitrary.
                dimension_semantics=("parallel", "arbitrary"),
                vmem_limit_bytes=vmem_limit),
            cost_estimate=cost,
        )(x2, w1t, b1, w2t, b2)

    try:
        out = run(True)
    except Exception:
        # TODO(synk): drop this fallback once pl.Buffered(1) pipeline_mode is
        # confirmed on the target jax version; default double-buffering is
        # functionally identical, it just spends 2x VMEM on resident operands.
        out = run(False)

    if padded:
        out = out[:M]
    # TODO(synk): dropout with p > 0 would need pltpu.prng_seed/prng_random_bits;
    # the module uses p=0.0 so it is an identity here.
    return out.reshape(N, L, d_model)


def reference_ffn(x, params):
    """Pure-JAX replica of the PyTorch forward for verification."""
    d_ff, d_model = params["conv1_w"].shape[0], params["conv1_w"].shape[1]
    w1 = params["conv1_w"].reshape(d_ff, d_model)
    w2 = params["conv2_w"].reshape(d_model, d_ff)
    h = jnp.einsum("nld,fd->nlf", x, w1) + params["conv1_b"]
    h = jnp.maximum(h, 0.0)
    return jnp.einsum("nlf,df->nld", h, w2) + params["conv2_b"]


def _make_case(key, N, L, d_model, d_ff):
    k = jax.random.split(key, 5)
    params = {
        # Conv1d weight layout: (out_channels, in_channels, kernel_size=1).
        "conv1_w": jax.random.normal(k[0], (d_ff, d_model, 1), jnp.float32)
                   * (1.0 / np.sqrt(d_model)),
        "conv1_b": jax.random.normal(k[1], (d_ff,), jnp.float32) * 0.01,
        "conv2_w": jax.random.normal(k[2], (d_model, d_ff, 1), jnp.float32)
                   * (1.0 / np.sqrt(d_ff)),
        "conv2_b": jax.random.normal(k[3], (d_model,), jnp.float32) * 0.01,
    }
    x = jax.random.normal(k[4], (N, L, d_model), jnp.float32)
    return x, params


if __name__ == "__main__":
    key = jax.random.PRNGKey(0)
    k1, k2 = jax.random.split(key)

    # --- Case 1: small module-consistent shapes (single-tile, single-chunk). ---
    x, params = _make_case(k1, N=2, L=16, d_model=128, d_ff=256)
    ref = jax.block_until_ready(reference_ffn(x, params))

    # bf16 MXU operands (default), f32 accumulate - standard bf16 FFN recipe.
    prep_bf16 = prepare_ffn_params(params)                      # bf16 default
    out_bf16 = jax.block_until_ready(poswise_ffn(x, prep_bf16))
    np.testing.assert_allclose(np.asarray(out_bf16), np.asarray(ref),
                               rtol=5e-2, atol=5e-2)

    # f32 operand path (tolerance covers MXU operand-rounding vs XLA reference).
    prep_f32 = prepare_ffn_params(params, compute_dtype=jnp.float32)
    out_f32 = jax.block_until_ready(poswise_ffn(x, prep_f32))
    np.testing.assert_allclose(np.asarray(out_f32), np.asarray(ref),
                               rtol=2e-2, atol=2e-2)

    # --- Case 2: multi row-tile + d_ff-chunked accumulator path. ---
    x2, params2 = _make_case(k2, N=2, L=512, d_model=256, d_ff=1024)
    ref2 = jax.block_until_ready(reference_ffn(x2, params2))
    prep2 = prepare_ffn_params(params2)                         # bf16 default
    out2 = jax.block_until_ready(
        poswise_ffn(x2, prep2, block_rows=256, block_k=256))    # grid (4, 4)
    np.testing.assert_allclose(np.asarray(out2), np.asarray(ref2),
                               rtol=6e-2, atol=6e-2)

    print("KERNEL_OK")
</pallas_src>

<mosaic_0001>
module attributes {stable_mosaic.version = 11 : i64} {
  func.func @_ffn_kernel(%arg0: i32, %arg1: i32, %arg2: memref<32x128xbf16, #tpu.memory_space<vmem>>, %arg3: memref<128x256xbf16, #tpu.memory_space<vmem>>, %arg4: memref<1x256xf32, #tpu.memory_space<vmem>>, %arg5: memref<256x128xbf16, #tpu.memory_space<vmem>>, %arg6: memref<1x128xf32, #tpu.memory_space<vmem>>, %arg7: memref<32x128xf32, #tpu.memory_space<vmem>>, %arg8: memref<32x128xf32, #tpu.memory_space<vmem>>) attributes {dimension_semantics = [#tpu.dimension_semantics<parallel>, #tpu.dimension_semantics<arbitrary>], iteration_bounds = array<i64: 1, 1>, scalar_prefetch = 0 : i64, scratch_operands = 1 : i64, tpu.core_type = #tpu.core_type<tc>, window_params = [{transform_indices = @transform_0, window_bounds = array<i64: 32, 128>}, {pipeline_mode = #tpu.pipeline_mode<synchronous>, transform_indices = @transform_1, window_bounds = array<i64: 128, 256>}, {pipeline_mode = #tpu.pipeline_mode<synchronous>, transform_indices = @transform_2, window_bounds = array<i64: 1, 256>}, {pipeline_mode = #tpu.pipeline_mode<synchronous>, transform_indices = @transform_3, window_bounds = array<i64: 256, 128>}, {pipeline_mode = #tpu.pipeline_mode<synchronous>, transform_indices = @transform_4, window_bounds = array<i64: 1, 128>}, {transform_indices = @transform_5, window_bounds = array<i64: 32, 128>}]} {
    %c0_i32 = arith.constant 0 : i32
    %0 = arith.cmpi eq, %arg1, %c0_i32 : i32
    %1 = arith.extui %0 : i1 to i32
    %c0_i32_0 = arith.constant 0 : i32
    %2 = arith.cmpi ne, %1, %c0_i32_0 : i32
    scf.if %2 {
      %c0_16 = arith.constant 0 : index
      %c0_17 = arith.constant 0 : index
      %20 = vector.load %arg6[%c0_16, %c0_17] : memref<1x128xf32, #tpu.memory_space<vmem>>, vector<1x128xf32>
      %21 = vector.shape_cast %20 : vector<1x128xf32> to vector<1x128xf32>
      %22 = vector.broadcast %21 : vector<1x128xf32> to vector<32x128xf32>
      %c0_18 = arith.constant 0 : index
      %c0_19 = arith.constant 0 : index
      %23 = vector.load %arg8[%c0_18, %c0_19] : memref<32x128xf32, #tpu.memory_space<vmem>>, vector<32x128xf32>
      tpu.vector_store %arg8[%c0_18, %c0_19], %22 {strides = array<i32>} : memref<32x128xf32, #tpu.memory_space<vmem>>, vector<32x128xf32>,
    } else {
    }
    %c0 = arith.constant 0 : index
    %c0_1 = arith.constant 0 : index
    %3 = vector.load %arg2[%c0, %c0_1] : memref<32x128xbf16, #tpu.memory_space<vmem>>, vector<32x128xbf16>
    %c0_2 = arith.constant 0 : index
    %c0_3 = arith.constant 0 : index
    %4 = vector.load %arg3[%c0_2, %c0_3] : memref<128x256xbf16, #tpu.memory_space<vmem>>, vector<128x256xbf16>
    %cst = arith.constant dense<0.000000e+00> : vector<32x256xf32>
    %5 = tpu.matmul %3, %4, %cst {dimension_numbers = #tpu.dot_dimension_numbers<[1], [0], [0], [1], [0, 0, 1, 1], [], []>} : vector<32x128xbf16>, vector<128x256xbf16>, vector<32x256xf32> -> vector<32x256xf32>
    %c0_4 = arith.constant 0 : index
    %c0_5 = arith.constant 0 : index
    %6 = vector.load %arg4[%c0_4, %c0_5] : memref<1x256xf32, #tpu.memory_space<vmem>>, vector<1x256xf32>
    %7 = vector.broadcast %6 : vector<1x256xf32> to vector<32x256xf32>
    %8 = arith.addf %5, %7 : vector<32x256xf32>
    %cst_6 = arith.constant 0.000000e+00 : f32
    %9 = vector.broadcast %cst_6 : f32 to vector<32x256xf32>
    %10 = arith.maximumf %8, %9 : vector<32x256xf32>
    %c0_7 = arith.constant 0 : index
    %c0_8 = arith.constant 0 : index
    %11 = vector.load %arg8[%c0_7, %c0_8] : memref<32x128xf32, #tpu.memory_space<vmem>>, vector<32x128xf32>
    %12 = arith.truncf %10 : vector<32x256xf32> to vector<32x256xbf16>
    %c0_9 = arith.constant 0 : index
    %c0_10 = arith.constant 0 : index
    %13 = vector.load %arg5[%c0_9, %c0_10] : memref<256x128xbf16, #tpu.memory_space<vmem>>, vector<256x128xbf16>
    %cst_11 = arith.constant dense<0.000000e+00> : vector<32x128xf32>
    %14 = tpu.matmul %12, %13, %cst_11 {dimension_numbers = #tpu.dot_dimension_numbers<[1], [0], [0], [1], [0, 0, 1, 1], [], []>} : vector<32x256xbf16>, vector<256x128xbf16>, vector<32x128xf32> -> vector<32x128xf32>
    %15 = arith.addf %11, %14 : vector<32x128xf32>
    %c0_12 = arith.constant 0 : index
    %c0_13 = arith.constant 0 : index
    %16 = vector.load %arg8[%c0_12, %c0_13] : memref<32x128xf32, #tpu.memory_space<vmem>>, vector<32x128xf32>
    tpu.vector_store %arg8[%c0_12, %c0_13], %15 {strides = array<i32>} : memref<32x128xf32, #tpu.memory_space<vmem>>, vector<32x128xf32>,
    %c0_i32_14 = arith.constant 0 : i32
    %17 = arith.cmpi eq, %arg1, %c0_i32_14 : i32
    %18 = arith.extui %17 : i1 to i32
    %c0_i32_15 = arith.constant 0 : i32
    %19 = arith.cmpi ne, %18, %c0_i32_15 : i32
    scf.if %19 {
      %c0_16 = arith.constant 0 : index
      %c0_17 = arith.constant 0 : index
      %20 = vector.load %arg8[%c0_16, %c0_17] : memref<32x128xf32, #tpu.memory_space<vmem>>, vector<32x128xf32>
      %c0_18 = arith.constant 0 : index
      %c0_19 = arith.constant 0 : index
      %21 = vector.load %arg7[%c0_18, %c0_19] : memref<32x128xf32, #tpu.memory_space<vmem>>, vector<32x128xf32>
      tpu.vector_store %arg7[%c0_18, %c0_19], %20 {strides = array<i32>} : memref<32x128xf32, #tpu.memory_space<vmem>>, vector<32x128xf32>,
    } else {
    }
    return
  }
  func.func @transform_0(%arg0: i32, %arg1: i32) -> (i32, i32) {
    %c0_i32 = arith.constant 0 : i32
    %c0_i32_0 = arith.constant 0 : i32
    return %arg0, %c0_i32 : i32, i32
  }
  func.func @transform_1(%arg0: i32, %arg1: i32) -> (i32, i32) {
    %c0_i32 = arith.constant 0 : i32
    %c0_i32_0 = arith.constant 0 : i32
    return %c0_i32, %arg1 : i32, i32
  }
  func.func @transform_2(%arg0: i32, %arg1: i32) -> (i32, i32) {
    %c0_i32 = arith.constant 0 : i32
    %c0_i32_0 = arith.constant 0 : i32
    return %c0_i32, %arg1 : i32, i32
  }
  func.func @transform_3(%arg0: i32, %arg1: i32) -> (i32, i32) {
    %c0_i32 = arith.constant 0 : i32
    %c0_i32_0 = arith.constant 0 : i32
    return %arg1, %c0_i32 : i32, i32
  }
  func.func @transform_4(%arg0: i32, %arg1: i32) -> (i32, i32) {
    %c0_i32 = arith.constant 0 : i32
    %c0_i32_0 = arith.constant 0 : i32
    %c0_i32_1 = arith.constant 0 : i32
    return %c0_i32, %c0_i32_0 : i32, i32
  }
  func.func @transform_5(%arg0: i32, %arg1: i32) -> (i32, i32) {
    %c0_i32 = arith.constant 0 : i32
    %c0_i32_0 = arith.constant 0 : i32
    return %arg0, %c0_i32 : i32, i32
  }
}

module attributes {stable_mosaic.version = 11 : i64} {
  func.func @_ffn_kernel(%arg0: i32, %arg1: i32, %arg2: memref<32x128xbf16, #tpu.memory_space<vmem>>, %arg3: memref<128x256xbf16, #tpu.memory_space<vmem>>, %arg4: memref<1x256xf32, #tpu.memory_space<vmem>>, %arg5: memref<256x128xbf16, #tpu.memory_space<vmem>>, %arg6: memref<1x128xf32, #tpu.memory_space<vmem>>, %arg7: memref<32x128xf32, #tpu.memory_space<vmem>>, %arg8: memref<32x128xf32, #tpu.memory_space<vmem>>) attributes {dimension_semantics = [#tpu.dimension_semantics<parallel>, #tpu.dimension_semantics<arbitrary>], iteration_bounds = array<i64: 1, 1>, scalar_prefetch = 0 : i64, scratch_operands = 1 : i64, tpu.core_type = #tpu.core_type<tc>, window_params = [{transform_indices = @transform_0, window_bounds = array<i64: 32, 128>}, {transform_indices = @transform_1, window_bounds = array<i64: 128, 256>}, {transform_indices = @transform_2, window_bounds = array<i64: 1, 256>}, {transform_indices = @transform_3, window_bounds = array<i64: 256, 128>}, {pipeline_mode = #tpu.pipeline_mode<synchronous>, transform_indices = @transform_4, window_bounds = array<i64: 1, 128>}, {transform_indices = @transform_5, window_bounds = array<i64: 32, 128>}]} {
    %c0_i32 = arith.constant 0 : i32
    %0 = arith.cmpi eq, %arg1, %c0_i32 : i32
    %1 = arith.extui %0 : i1 to i32
    %c0_i32_0 = arith.constant 0 : i32
    %2 = arith.cmpi ne, %1, %c0_i32_0 : i32
    scf.if %2 {
      %c0_16 = arith.constant 0 : index
      %c0_17 = arith.constant 0 : index
      %20 = vector.load %arg6[%c0_16, %c0_17] : memref<1x128xf32, #tpu.memory_space<vmem>>, vector<1x128xf32>
      %21 = vector.shape_cast %20 : vector<1x128xf32> to vector<1x128xf32>
      %22 = vector.broadcast %21 : vector<1x128xf32> to vector<32x128xf32>
      %c0_18 = arith.constant 0 : index
      %c0_19 = arith.constant 0 : index
      %23 = vector.load %arg8[%c0_18, %c0_19] : memref<32x128xf32, #tpu.memory_space<vmem>>, vector<32x128xf32>
      tpu.vector_store %arg8[%c0_18, %c0_19], %22 {strides = array<i32>} : memref<32x128xf32, #tpu.memory_space<vmem>>, vector<32x128xf32>,
    } else {
    }
    %c0 = arith.constant 0 : index
    %c0_1 = arith.constant 0 : index
    %3 = vector.load %arg2[%c0, %c0_1] : memref<32x128xbf16, #tpu.memory_space<vmem>>, vector<32x128xbf16>
    %c0_2 = arith.constant 0 : index
    %c0_3 = arith.constant 0 : index
    %4 = vector.load %arg3[%c0_2, %c0_3] : memref<128x256xbf16, #tpu.memory_space<vmem>>, vector<128x256xbf16>
    %cst = arith.constant dense<0.000000e+00> : vector<32x256xf32>
    %5 = tpu.matmul %3, %4, %cst {dimension_numbers = #tpu.dot_dimension_numbers<[1], [0], [0], [1], [0, 0, 1, 1], [], []>} : vector<32x128xbf16>, vector<128x256xbf16>, vector<32x256xf32> -> vector<32x256xf32>
    %c0_4 = arith.constant 0 : index
    %c0_5 = arith.constant 0 : index
    %6 = vector.load %arg4[%c0_4, %c0_5] : memref<1x256xf32, #tpu.memory_space<vmem>>, vector<1x256xf32>
    %7 = vector.broadcast %6 : vector<1x256xf32> to vector<32x256xf32>
    %8 = arith.addf %5, %7 : vector<32x256xf32>
    %cst_6 = arith.constant 0.000000e+00 : f32
    %9 = vector.broadcast %cst_6 : f32 to vector<32x256xf32>
    %10 = arith.maximumf %8, %9 : vector<32x256xf32>
    %c0_7 = arith.constant 0 : index
    %c0_8 = arith.constant 0 : index
    %11 = vector.load %arg8[%c0_7, %c0_8] : memref<32x128xf32, #tpu.memory_space<vmem>>, vector<32x128xf32>
    %12 = arith.truncf %10 : vector<32x256xf32> to vector<32x256xbf16>
    %c0_9 = arith.constant 0 : index
    %c0_10 = arith.constant 0 : index
    %13 = vector.load %arg5[%c0_9, %c0_10] : memref<256x128xbf16, #tpu.memory_space<vmem>>, vector<256x128xbf16>
    %cst_11 = arith.constant dense<0.000000e+00> : vector<32x128xf32>
    %14 = tpu.matmul %12, %13, %cst_11 {dimension_numbers = #tpu.dot_dimension_numbers<[1], [0], [0], [1], [0, 0, 1, 1], [], []>} : vector<32x256xbf16>, vector<256x128xbf16>, vector<32x128xf32> -> vector<32x128xf32>
    %15 = arith.addf %11, %14 : vector<32x128xf32>
    %c0_12 = arith.constant 0 : index
    %c0_13 = arith.constant 0 : index
    %16 = vector.load %arg8[%c0_12, %c0_13] : memref<32x128xf32, #tpu.memory_space<vmem>>, vector<32x128xf32>
    tpu.vector_store %arg8[%c0_12, %c0_13], %15 {strides = array<i32>} : memref<32x128xf32, #tpu.memory_space<vmem>>, vector<32x128xf32>,
    %c0_i32_14 = arith.constant 0 : i32
    %17 = arith.cmpi eq, %arg1, %c0_i32_14 : i32
    %18 = arith.extui %17 : i1 to i32
    %c0_i32_15 = arith.constant 0 : i32
    %19 = arith.cmpi ne, %18, %c0_i32_15 : i32
    scf.if %19 {
      %c0_16 = arith.constant 0 : index
      %c0_17 = arith.constant 0 : index
      %20 = vector.load %arg8[%c0_16, %c0_17] : memref<32x128xf32, #tpu.memory_space<vmem>>, vector<32x128xf32>
      %c0_18 = arith.constant 0 : index
      %c0_19 = arith.constant 0 : index
      %21 = vector.load %arg7[%c0_18, %c0_19] : memref<32x128xf32, #tpu.memory_space<vmem>>, vector<32x128xf32>
      tpu.vector_store %arg7[%c0_18, %c0_19], %20 {strides = array<i32>} : memref<32x128xf32, #tpu.memory_space<vmem>>, vector<32x128xf32>,
    } else {
    }
    return
  }
  func.func @transform_0(%arg0: i32, %arg1: i32) -> (i32, i32) {
    %c0_i32 = arith.constant 0 : i32
    %c0_i32_0 = arith.constant 0 : i32
    return %arg0, %c0_i32 : i32, i32
  }
  func.func @transform_1(%arg0: i32, %arg1: i32) -> (i32, i32) {
    %c0_i32 = arith.constant 0 : i32
    %c0_i32_0 = arith.constant 0 : i32
    return %c0_i32, %arg1 : i32, i32
  }
  func.func @transform_2(%arg0: i32, %arg1: i32) -> (i32, i32) {
    %c0_i32 = arith.constant 0 : i32
    %c0_i32_0 = arith.constant 0 : i32
    return %c0_i32, %arg1 : i32, i32
  }
  func.func @transform_3(%arg0: i32, %arg1: i32) -> (i32, i32) {
    %c0_i32 = arith.constant 0 : i32
    %c0_i32_0 = arith.constant 0 : i32
    return %arg1, %c0_i32 : i32, i32
  }
  func.func @transform_4(%arg0: i32, %arg1: i32) -> (i32, i32) {
    %c0_i32 = arith.constant 0 : i32
    %c0_i32_0 = arith.constant 0 : i32
    %c0_i32_1 = arith.constant 0 : i32
    return %c0_i32, %c0_i32_0 : i32, i32
  }
  func.func @transform_5(%arg0: i32, %arg1: i32) -> (i32, i32) {
    %c0_i32 = arith.constant 0 : i32
    %c0_i32_0 = arith.constant 0 : i32
    return %arg0, %c0_i32 : i32, i32
  }
}

</mosaic_0001>

<bundles_post_ra>
// kernel: tpu_custom_call.1
= control target key start
LH: loop header
LB: loop body
LE: loop exit
PB: predicated region body
PF: predicated region fallthrough
CT: control target
= control target key end

     0   :  { %10 = vsyncpa [#allocation4], 0  ;;  %s748_s0 = inlined_call_operand.hbm [shape: bf16[32,128], index: 0, kind: input, shape index: {}]   ;;  %s749_s1 = inlined_call_operand.hbm [shape: bf16[128,256], index: 1, kind: input, shape index: {}]   ;;  %s750_s2 = inlined_call_operand.vmem [shape: f32[1,256], index: 2, kind: input, shape index: {}]   ;;  %s751_s3 = inlined_call_operand.hbm [shape: bf16[256,128], index: 3, kind: input, shape index: {}]   ;;  %s752_s4 = inlined_call_operand.vmem [shape: f32[1,128], index: 4, kind: input, shape index: {}]   ;;  %s753_s5 = inlined_call_operand.hbm [shape: f32[32,128], index: 5, kind: output, shape index: {}]  }
   0x1   :  { %11 = vsyncpa [#allocation7], 0 }
   0x2   :  { %12 = vsyncpa [#allocation5], 0  ;;  %s685_s18 = smov [#allocation6]  }
   0x3   :  { %s30_s19 = sshll.u32 %s685_s18, 4  ;;  %s31_s19 = int_to_ptr.vmem [resolvable:$true] %s30_s19 }
   0x4   :  { %s607_s20 = scalar_lea.vmem %s31_s19, 2048  ;;  %p612_p1 = scmp.lt.s32.totalorder %s31_s19, %s31_s19 }
   0x5   :  { %p608_p0 = scmp.ne.s32.totalorder %s31_s19, %s607_s20  ;;  %p613_p2 = scmp.lt.s32.totalorder %s607_s20, %s607_s20 }
   0x7   :  { %p614_p3 = por %p613_p2, %p612_p1 }
   0x9   :  { %p615_p4 = pnand %p614_p3, %p608_p0 }
   0xb   :  { %618 = shalt.err (!%p615_p4)
}
   0xc   :  { %s686_s21 = smov 128   ;;  %s687_s22 = smov 8  }
   0xd   :  { %36 = dma.hbm_to_vmem [thread:$0]  %s749_s1, 2048, %s31_s19, [#allocation7], %s686_s21, %s686_s21, %s687_s22  }
   0xe   :  { %s688_s25 = smov [#allocation3]  }
   0xf   :  { %s18_s26 = sshll.u32 %s688_s25, 4  ;;  %s19_s26 = int_to_ptr.vmem [resolvable:$true] %s18_s26 }
  0x10   :  { %s627_s27 = scalar_lea.vmem %s19_s26, 256  ;;  %p632_p6 = scmp.lt.s32.totalorder %s19_s26, %s19_s26 }
  0x11   :  { %p628_p5 = scmp.ne.s32.totalorder %s19_s26, %s627_s27  ;;  %p633_p7 = scmp.lt.s32.totalorder %s627_s27, %s627_s27 }
  0x13   :  { %p634_p8 = por %p633_p7, %p632_p6 }
  0x15   :  { %p635_p9 = pnand %p634_p8, %p628_p5 }
  0x17   :  { %638 = shalt.err (!%p635_p9)
}
  0x18   :  { %s689_s28 = smov 64   ;;  %s690_s29 = smov 4  }
  0x19   :  { %24 = dma.hbm_to_vmem [thread:$0]  %s748_s0, 256, %s19_s26, [#allocation4], %s689_s28, %s689_s28, %s690_s29  }
  0x1a   :  { %s691_s7 = smov [#allocation8]  }
  0x1b   :  { %s44_s8 = sshll.u32 %s691_s7, 4  ;;  %s45_s8 = int_to_ptr.vmem [resolvable:$true] %s44_s8 }
  0x1c   :  { %s647_s1 = scalar_lea.vmem %s45_s8, 2048  ;;  %p652_p11 = scmp.lt.s32.totalorder %s45_s8, %s45_s8 }
  0x1d   :  { %p648_p10 = scmp.ne.s32.totalorder %s45_s8, %s647_s1  ;;  %p653_p12 = scmp.lt.s32.totalorder %s647_s1, %s647_s1 }
  0x1f   :  { %p654_p13 = por %p653_p12, %p652_p11 }
  0x21   :  { %p655_p0 = pnand %p654_p13, %p648_p10 }
  0x23   :  { %658 = shalt.err (!%p655_p0)
}
  0x24   :  { %50 = dma.hbm_to_vmem [thread:$0]  %s751_s3, 2048, %s45_s8, [#allocation7], %s689_s28, %s689_s28, %s690_s29  }
  0x25   :  { %679 = dma.done.wait [#allocation4], 256  }
  0x26   :  { %680 = vsyncadd [#allocation4], 4294967040 }
  0x27   :  { %681 = dma.done.wait [#allocation7], 4096  }
  0x28   :  { %682 = vsyncadd [#allocation7], 4294963200  ;;  %v692_v0 = vmov 0   ;;  %v557_v1 = vld [vmem:[#allocation6 + $0x74] ss:$8 sps:$4 sm:$0xff]   ;;  %v587_v16 = vld [vmem:[#allocation8 + $0x68] sm:$0xff]   ;;  %v100_v35 = vlaneseq }
  0x29   :  { %234 = vmatprep.mubr.bf16.mxu0 %v692_v0  ;;  %v559_v2 = vld [vmem:[#allocation6 + $0x70] ss:$8 sps:$4 sm:$0xff]   ;;  %202 = vmatprep.subr.bf16.mxu0 %v557_v1  ;;  %v560_v3 = vld [vmem:[#allocation6 + $0x64] ss:$8 sps:$4 sm:$0xff]   ;;  %v562_v4 = vld [vmem:[#allocation6 + $0x60] ss:$8 sps:$4 sm:$0xff]  }
  0x2a   :  { %203 = vmatpush1.bf16.msra.mxu0 %v559_v2  ;;  %v563_v5 = vld [vmem:[#allocation6 + $0x54] ss:$8 sps:$4 sm:$0xff]   ;;  %v565_v6 = vld [vmem:[#allocation6 + $0x50] ss:$8 sps:$4 sm:$0xff]   ;;  %v566_v7 = vld [vmem:[#allocation6 + $0x44] ss:$8 sps:$4 sm:$0xff]  }
  0x2b   :  { %204 = vmatprep.subr.bf16.mxu0 %v560_v3  ;;  %v568_v8 = vld [vmem:[#allocation6 + $0x40] ss:$8 sps:$4 sm:$0xff]   ;;  %v569_v9 = vld [vmem:[#allocation6 + $0x34] ss:$8 sps:$4 sm:$0xff]   ;;  %v571_v10 = vld [vmem:[#allocation6 + $0x30] ss:$8 sps:$4 sm:$0xff]  }
  0x2c   :  { %v583_v11 = vld [vmem:[#allocation8 + $0x78] sm:$0xff]   ;;  %v572_v12 = vld [vmem:[#allocation6 + $0x24] ss:$8 sps:$4 sm:$0xff]   ;;  %v585_v14 = vld [vmem:[#allocation8 + $0x70] sm:$0xff]   ;;  %v101_v36 = vshrl.u32 %v100_v35, 7  ;;  %s693_s12 = smov [#allocation9]  }
  0x2d   :  { %v584_v13 = vld [vmem:[#allocation8 + $0x38] sm:$0xff]   ;;  %520 = vmatprep.subr.bf16.mxu1 %v583_v11  ;;  %v586_v15 = vld [vmem:[#allocation8 + $0x30] sm:$0xff]   ;;  %v574_v17 = vld [vmem:[#allocation6 + $0x20] ss:$8 sps:$4 sm:$0xff]   ;;  %s472_s13 = sshll.u32 %s693_s12, 4  ;;  %s473_s13 = int_to_ptr.vmem [resolvable:$true] %s472_s13 }
  0x2e   :  { %205 = vmatpush1.bf16.msra.mxu0 %v562_v4  ;;  %521 = vmatpush3.bf16.msra.mxu1 %v584_v13  ;;  %v575_v18 = vld [vmem:[#allocation6 + $0x14] ss:$8 sps:$4 sm:$0xff]   ;;  %v588_v19 = vld [vmem:[#allocation8 + $0x28] sm:$0xff]   ;;  %v577_v20 = vld [vmem:[#allocation6 + $0x10] ss:$8 sps:$4 sm:$0xff]   ;;  %v106_v37 = vsub.s32 1, %v101_v36  ;;  %p664_p2 = scmp.lt.s32.totalorder %s473_s13, %s473_s13 }
  0x2f   :  { %206 = vmatprep.subr.bf16.mxu0 %v563_v5  ;;  %522 = vmatprep.subr.bf16.mxu1 %v585_v14  ;;  %v589_v21 = vld [vmem:[#allocation8 + $0x60] sm:$0xff]   ;;  %v591_v24 = vld [vmem:[#allocation8 + $0x58] sm:$0xff]   ;;  %v581_v27 = vld [vmem:[#allocation3] sm:$0xff]   ;;  %v102_v38 = vsub.s32 0, %v101_v36 }
  0x30   :  { %v578_v22 = vld [vmem:[#allocation6 + $0x4] ss:$8 sps:$4 sm:$0xff]   ;;  %v580_v25 = vld [vmem:[#allocation6] ss:$8 sps:$4 sm:$0xff]   ;;  %v592_v26 = vld [vmem:[#allocation8 + $0x18] sm:$0xff]  }
  0x31   :  { %v590_v23 = vld [vmem:[#allocation8 + $0x20] sm:$0xff]   ;;  %v582_v28 = vld [vmem:[#allocation3 + $0x8] sm:$0xff]   ;;  %v593_v29 = vld [vmem:[#allocation8 + $0x50] sm:$0xff]  }
  0x32   :  { %207 = vmatpush1.bf16.msra.mxu0 %v565_v6  ;;  %523 = vmatpush3.bf16.msra.mxu1 %v586_v15  ;;  %v594_v30 = vld [vmem:[#allocation8 + $0x10] sm:$0xff]   ;;  %v595_v31 = vld [vmem:[#allocation8 + $0x48] sm:$0xff]   ;;  %v597_v33 = vld [vmem:[#allocation8 + $0x40] sm:$0xff]  }
  0x33   :  { %208 = vmatprep.subr.bf16.mxu0 %v566_v7  ;;  %524 = vmatprep.subr.bf16.mxu1 %v587_v16  ;;  %v596_v32 = vld [vmem:[#allocation8 + $0x8] sm:$0xff]   ;;  %v598_v34 = vld [vmem:[#allocation8] sm:$0xff]   ;;  %v98_v39 = vld [vmem:[%s750_s2] sm:$0x3] }
  0x34   :  { %v107_v41 = vrot.slane %v98_v39, %v106_v37  ;;  %v103_v42 = vrot.slane %v98_v39, %v102_v38  ;;  %v485_v7 = vld [vmem:[%s752_s4] ss:$0 sm:$0xff]  ;;  %s659_s4 = scalar_lea.vmem %s473_s13, 512 }
  0x35   :  { %p660_p1 = scmp.ne.s32.totalorder %s473_s13, %s659_s4  ;;  %p665_p3 = scmp.lt.s32.totalorder %s659_s4, %s659_s4 }
  0x36   :  { %209 = vmatpush1.bf16.msra.mxu0 %v568_v8  ;;  %525 = vmatpush3.bf16.msra.mxu1 %v588_v19 }
  0x37   :  { %210 = vmatprep.subr.bf16.mxu0 %v569_v9  ;;  %526 = vmatprep.subr.bf16.mxu1 %v589_v21  ;;  %p666_p4 = por %p665_p3, %p664_p2 }
  0x39   :  { %p667_p5 = pnand %p666_p4, %p660_p1 }
  0x3a   :  { %211 = vmatpush1.bf16.msra.mxu0 %v571_v10  ;;  %527 = vmatpush3.bf16.msra.mxu1 %v590_v23 }
  0x3b   :  { %212 = vmatprep.subr.bf16.mxu0 %v572_v12  ;;  %528 = vmatprep.subr.bf16.mxu1 %v591_v24 }
  0x3e   :  { %213 = vmatpush1.bf16.msra.mxu0 %v574_v17  ;;  %529 = vmatpush3.bf16.msra.mxu1 %v592_v26 }
  0x3f   :  { %214 = vmatprep.subr.bf16.mxu0 %v575_v18  ;;  %530 = vmatprep.subr.bf16.mxu1 %v593_v29 }
  0x42   :  { %215 = vmatpush1.bf16.msra.mxu0 %v577_v20  ;;  %531 = vmatpush3.bf16.msra.mxu1 %v594_v30 }
  0x43   :  { %216 = vmatprep.subr.bf16.mxu0 %v578_v22  ;;  %532 = vmatprep.subr.bf16.mxu1 %v595_v31 }
  0x46   :  { %217 = vmatpush1.bf16.msra.mxu0 %v580_v25  ;;  %533 = vmatpush3.bf16.msra.mxu1 %v596_v32 }
  0x47   :  { %534 = vmatprep.subr.bf16.mxu1 %v597_v33 }
  0x49   :  { %235 = vmatmul.mubr.bf16.vlgmr.msra.gmra.mxu0 %v581_v27 }
  0x4a   :  { %244 = vmatprep.mubr.bf16.mxu0 %v692_v0  ;;  %535 = vmatpush3.bf16.msra.mxu1 %v598_v34 }
  0x51   :  { %245 = vmatmul.mubr.bf16.gmra.mxu0 %v582_v28 }
 0x109   :  { %v236_v40 = vpop.f32.mrf.mxu0 }
 0x10a   :  { %v237_v47 = vadd.f32 %v236_v40, %v103_v42 }
 0x10b   :  { %v238_v43 = vpop.f32.mrf.mxu0 }
 0x10c   :  { %v239_v45 = vadd.f32 %v238_v43, %v107_v41  ;;  %v255_v54 = vmax.f32 %v237_v47, 0.0 }
 0x10d   :  { %v240_v44 = vpop.f32.mrf.mxu0 }
 0x10e   :  { %v241_v46 = vadd.f32 %v240_v44, %v103_v42  ;;  %v256_v52 = vmax.f32 %v239_v45, 0.0 }
 0x10f   :  { %v242_v48 = vpop.f32.mrf.mxu0 }
 0x110   :  { %v243_v49 = vadd.f32 %v242_v48, %v107_v41  ;;  %v257_v50 = vmax.f32 %v241_v46, 0.0 }
 0x111   :  { %v246_v51 = vpop.f32.mrf.mxu0 }
 0x112   :  { %v258_v53 = vmax.f32 %v243_v49, 0.0  ;;  %v267_v57 = vpack.c.bf16 %v257_v50, %v255_v54  ;;  %v247_v61 = vadd.f32 %v246_v51, %v103_v42 }
 0x113   :  { %v248_v55 = vpop.f32.mrf.mxu0 }
 0x114   :  { %v268_v56 = vpack.c.bf16 %v258_v53, %v256_v52  ;;  %v249_v59 = vadd.f32 %v248_v55, %v107_v41  ;;  %v259_v3 = vmax.f32 %v247_v61, 0.0 }
 0x115   :  { %v250_v58 = vpop.f32.mrf.mxu0 }
 0x116   :  { %v251_v60 = vadd.f32 %v250_v58, %v103_v42  ;;  %431 = vmatprep.mubr.bf16.mxu1 %v268_v56  ;;  %v260_v1 = vmax.f32 %v249_v59, 0.0 }
 0x117   :  { %v252_v62 = vpop.f32.mrf.mxu0  ;;  %432 = vmatmul.mubr.bf16.vlgmr.msra.gmra.mxu1 %v267_v57 }
 0x118   :  { %v253_v63 = vadd.f32 %v252_v62, %v107_v41  ;;  %v261_v0 = vmax.f32 %v251_v60, 0.0 }
 0x11a   :  { %v262_v2 = vmax.f32 %v253_v63, 0.0  ;;  %v269_v5 = vpack.c.bf16 %v261_v0, %v259_v3 }
 0x11c   :  { %v270_v4 = vpack.c.bf16 %v262_v2, %v260_v1 }
 0x11e   :  { %439 = vmatprep.mubr.bf16.mxu1 %v270_v4 }
 0x11f   :  { %440 = vmatmul.mubr.bf16.gmra.mxu1 %v269_v5 }
 0x1d7   :  { %v536_v6 = vpop.f32.mrf.mxu1 }
 0x1d9   :  { %v537_v8 = vpop.f32.mrf.mxu1 }
 0x1da   :  { %v538_v9 = vadd.f32 %v537_v8, %v536_v6 }
 0x1db   :  { %v539_v10 = vpop.f32.mrf.mxu1 }
 0x1dc   :  { %v448_v11 = vadd.f32 %v538_v9, %v485_v7 }
 0x1dd   :  { %v540_v12 = vpop.f32.mrf.mxu1 }
 0x1de   :  { %463 = vst [vmem:[#allocation9] sm:$0xff] %v448_v11  ;;  %v541_v13 = vadd.f32 %v540_v12, %v539_v10 }
 0x1df   :  { %v542_v14 = vpop.f32.mrf.mxu1 }
 0x1e0   :  { %v449_v15 = vadd.f32 %v541_v13, %v485_v7 }
 0x1e1   :  { %v543_v16 = vpop.f32.mrf.mxu1 }
 0x1e2   :  { %464 = vst [vmem:[#allocation9 + $0x8] sm:$0xff] %v449_v15  ;;  %v544_v17 = vadd.f32 %v543_v16, %v542_v14 }
 0x1e3   :  { %v545_v18 = vpop.f32.mrf.mxu1 }
 0x1e4   :  { %v450_v19 = vadd.f32 %v544_v17, %v485_v7 }
 0x1e5   :  { %v546_v20 = vpop.f32.mrf.mxu1 }
 0x1e6   :  { %465 = vst [vmem:[#allocation9 + $0x10] sm:$0xff] %v450_v19  ;;  %v547_v21 = vadd.f32 %v546_v20, %v545_v18 }
 0x1e8   :  { %v451_v22 = vadd.f32 %v547_v21, %v485_v7 }
 0x1ea   :  { %466 = vst [vmem:[#allocation9 + $0x18] sm:$0xff] %v451_v22 }
 0x1eb   :  { %670 = shalt.err (!%p667_p5)
}
 0x1ec   :  { %478 = dma.vmem_to_hbm [thread:$0]  %s473_s13, 512, %s753_s5, [#allocation5], %s686_s21, %s686_s21, %s687_s22  }
 0x1ed   :  { %683 = dma.done.wait [#allocation5], 512  }
 0x1ee   :  { %684 = vsyncadd [#allocation5], 4294966784 }
 0x1ef   :  { %482 = vsyncpa [#allocation4], 1 }
 0x1f0   :  { %483 = vsyncpa [#allocation7], 1 }
 0x1f1   :  { %484 = vsyncpa [#allocation5], 1 }

// kernel: tpu_custom_call.1
= control target key start
LH: loop header
LB: loop body
LE: loop exit
PB: predicated region body
PF: predicated region fallthrough
CT: control target
= control target key end

     0   :  { %10 = vsyncpa [#allocation4], 0  ;;  %s748_s0 = inlined_call_operand.hbm [shape: bf16[32,128], index: 0, kind: input, shape index: {}]   ;;  %s749_s1 = inlined_call_operand.hbm [shape: bf16[128,256], index: 1, kind: input, shape index: {}]   ;;  %s750_s2 = inlined_call_operand.vmem [shape: f32[1,256], index: 2, kind: input, shape index: {}]   ;;  %s751_s3 = inlined_call_operand.hbm [shape: bf16[256,128], index: 3, kind: input, shape index: {}]   ;;  %s752_s4 = inlined_call_operand.vmem [shape: f32[1,128], index: 4, kind: input, shape index: {}]   ;;  %s753_s5 = inlined_call_operand.hbm [shape: f32[32,128], index: 5, kind: output, shape index: {}]  }
   0x1   :  { %11 = vsyncpa [#allocation7], 0 }
   0x2   :  { %12 = vsyncpa [#allocation5], 0  ;;  %s685_s18 = smov [#allocation6]  }
   0x3   :  { %s30_s19 = sshll.u32 %s685_s18, 4  ;;  %s31_s19 = int_to_ptr.vmem [resolvable:$true] %s30_s19 }
   0x4   :  { %s607_s20 = scalar_lea.vmem %s31_s19, 2048  ;;  %p612_p1 = scmp.lt.s32.totalorder %s31_s19, %s31_s19 }
   0x5   :  { %p608_p0 = scmp.ne.s32.totalorder %s31_s19, %s607_s20  ;;  %p613_p2 = scmp.lt.s32.totalorder %s607_s20, %s607_s20 }
   0x7   :  { %p614_p3 = por %p613_p2, %p612_p1 }
   0x9   :  { %p615_p4 = pnand %p614_p3, %p608_p0 }
   0xb   :  { %618 = shalt.err (!%p615_p4)
}
   0xc   :  { %s686_s21 = smov 128   ;;  %s687_s22 = smov 8  }
   0xd   :  { %36 = dma.hbm_to_vmem [thread:$0]  %s749_s1, 2048, %s31_s19, [#allocation7], %s686_s21, %s686_s21, %s687_s22  }
   0xe   :  { %s688_s25 = smov [#allocation3]  }
   0xf   :  { %s18_s26 = sshll.u32 %s688_s25, 4  ;;  %s19_s26 = int_to_ptr.vmem [resolvable:$true] %s18_s26 }
  0x10   :  { %s627_s27 = scalar_lea.vmem %s19_s26, 256  ;;  %p632_p6 = scmp.lt.s32.totalorder %s19_s26, %s19_s26 }
  0x11   :  { %p628_p5 = scmp.ne.s32.totalorder %s19_s26, %s627_s27  ;;  %p633_p7 = scmp.lt.s32.totalorder %s627_s27, %s627_s27 }
  0x13   :  { %p634_p8 = por %p633_p7, %p632_p6 }
  0x15   :  { %p635_p9 = pnand %p634_p8, %p628_p5 }
  0x17   :  { %638 = shalt.err (!%p635_p9)
}
  0x18   :  { %s689_s28 = smov 64   ;;  %s690_s29 = smov 4  }
  0x19   :  { %24 = dma.hbm_to_vmem [thread:$0]  %s748_s0, 256, %s19_s26, [#allocation4], %s689_s28, %s689_s28, %s690_s29  }
  0x1a   :  { %s691_s7 = smov [#allocation8]  }
  0x1b   :  { %s44_s8 = sshll.u32 %s691_s7, 4  ;;  %s45_s8 = int_to_ptr.vmem [resolvable:$true] %s44_s8 }
  0x1c   :  { %s647_s1 = scalar_lea.vmem %s45_s8, 2048  ;;  %p652_p11 = scmp.lt.s32.totalorder %s45_s8, %s45_s8 }
  0x1d   :  { %p648_p10 = scmp.ne.s32.totalorder %s45_s8, %s647_s1  ;;  %p653_p12 = scmp.lt.s32.totalorder %s647_s1, %s647_s1 }
  0x1f   :  { %p654_p13 = por %p653_p12, %p652_p11 }
  0x21   :  { %p655_p0 = pnand %p654_p13, %p648_p10 }
  0x23   :  { %658 = shalt.err (!%p655_p0)
}
  0x24   :  { %50 = dma.hbm_to_vmem [thread:$0]  %s751_s3, 2048, %s45_s8, [#allocation7], %s689_s28, %s689_s28, %s690_s29  }
  0x25   :  { %679 = dma.done.wait [#allocation4], 256  }
  0x26   :  { %680 = vsyncadd [#allocation4], 4294967040 }
  0x27   :  { %681 = dma.done.wait [#allocation7], 4096  }
  0x28   :  { %682 = vsyncadd [#allocation7], 4294963200  ;;  %v692_v0 = vmov 0   ;;  %v557_v1 = vld [vmem:[#allocation6 + $0x74] ss:$8 sps:$4 sm:$0xff]   ;;  %v587_v16 = vld [vmem:[#allocation8 + $0x68] sm:$0xff]   ;;  %v100_v35 = vlaneseq }
  0x29   :  { %234 = vmatprep.mubr.bf16.mxu0 %v692_v0  ;;  %v559_v2 = vld [vmem:[#allocation6 + $0x70] ss:$8 sps:$4 sm:$0xff]   ;;  %202 = vmatprep.subr.bf16.mxu0 %v557_v1  ;;  %v560_v3 = vld [vmem:[#allocation6 + $0x64] ss:$8 sps:$4 sm:$0xff]   ;;  %v562_v4 = vld [vmem:[#allocation6 + $0x60] ss:$8 sps:$4 sm:$0xff]  }
  0x2a   :  { %203 = vmatpush1.bf16.msra.mxu0 %v559_v2  ;;  %v563_v5 = vld [vmem:[#allocation6 + $0x54] ss:$8 sps:$4 sm:$0xff]   ;;  %v565_v6 = vld [vmem:[#allocation6 + $0x50] ss:$8 sps:$4 sm:$0xff]   ;;  %v566_v7 = vld [vmem:[#allocation6 + $0x44] ss:$8 sps:$4 sm:$0xff]  }
  0x2b   :  { %204 = vmatprep.subr.bf16.mxu0 %v560_v3  ;;  %v568_v8 = vld [vmem:[#allocation6 + $0x40] ss:$8 sps:$4 sm:$0xff]   ;;  %v569_v9 = vld [vmem:[#allocation6 + $0x34] ss:$8 sps:$4 sm:$0xff]   ;;  %v571_v10 = vld [vmem:[#allocation6 + $0x30] ss:$8 sps:$4 sm:$0xff]  }
  0x2c   :  { %v583_v11 = vld [vmem:[#allocation8 + $0x78] sm:$0xff]   ;;  %v572_v12 = vld [vmem:[#allocation6 + $0x24] ss:$8 sps:$4 sm:$0xff]   ;;  %v585_v14 = vld [vmem:[#allocation8 + $0x70] sm:$0xff]   ;;  %v101_v36 = vshrl.u32 %v100_v35, 7  ;;  %s693_s12 = smov [#allocation9]  }
  0x2d   :  { %v584_v13 = vld [vmem:[#allocation8 + $0x38] sm:$0xff]   ;;  %520 = vmatprep.subr.bf16.mxu1 %v583_v11  ;;  %v586_v15 = vld [vmem:[#allocation8 + $0x30] sm:$0xff]   ;;  %v574_v17 = vld [vmem:[#allocation6 + $0x20] ss:$8 sps:$4 sm:$0xff]   ;;  %s472_s13 = sshll.u32 %s693_s12, 4  ;;  %s473_s13 = int_to_ptr.vmem [resolvable:$true] %s472_s13 }
  0x2e   :  { %205 = vmatpush1.bf16.msra.mxu0 %v562_v4  ;;  %521 = vmatpush3.bf16.msra.mxu1 %v584_v13  ;;  %v575_v18 = vld [vmem:[#allocation6 + $0x14] ss:$8 sps:$4 sm:$0xff]   ;;  %v588_v19 = vld [vmem:[#allocation8 + $0x28] sm:$0xff]   ;;  %v577_v20 = vld [vmem:[#allocation6 + $0x10] ss:$8 sps:$4 sm:$0xff]   ;;  %v106_v37 = vsub.s32 1, %v101_v36  ;;  %p664_p2 = scmp.lt.s32.totalorder %s473_s13, %s473_s13 }
  0x2f   :  { %206 = vmatprep.subr.bf16.mxu0 %v563_v5  ;;  %522 = vmatprep.subr.bf16.mxu1 %v585_v14  ;;  %v589_v21 = vld [vmem:[#allocation8 + $0x60] sm:$0xff]   ;;  %v591_v24 = vld [vmem:[#allocation8 + $0x58] sm:$0xff]   ;;  %v581_v27 = vld [vmem:[#allocation3] sm:$0xff]   ;;  %v102_v38 = vsub.s32 0, %v101_v36 }
  0x30   :  { %v578_v22 = vld [vmem:[#allocation6 + $0x4] ss:$8 sps:$4 sm:$0xff]   ;;  %v580_v25 = vld [vmem:[#allocation6] ss:$8 sps:$4 sm:$0xff]   ;;  %v592_v26 = vld [vmem:[#allocation8 + $0x18] sm:$0xff]  }
  0x31   :  { %v590_v23 = vld [vmem:[#allocation8 + $0x20] sm:$0xff]   ;;  %v582_v28 = vld [vmem:[#allocation3 + $0x8] sm:$0xff]   ;;  %v593_v29 = vld [vmem:[#allocation8 + $0x50] sm:$0xff]  }
  0x32   :  { %207 = vmatpush1.bf16.msra.mxu0 %v565_v6  ;;  %523 = vmatpush3.bf16.msra.mxu1 %v586_v15  ;;  %v594_v30 = vld [vmem:[#allocation8 + $0x10] sm:$0xff]   ;;  %v595_v31 = vld [vmem:[#allocation8 + $0x48] sm:$0xff]   ;;  %v597_v33 = vld [vmem:[#allocation8 + $0x40] sm:$0xff]  }
  0x33   :  { %208 = vmatprep.subr.bf16.mxu0 %v566_v7  ;;  %524 = vmatprep.subr.bf16.mxu1 %v587_v16  ;;  %v596_v32 = vld [vmem:[#allocation8 + $0x8] sm:$0xff]   ;;  %v598_v34 = vld [vmem:[#allocation8] sm:$0xff]   ;;  %v98_v39 = vld [vmem:[%s750_s2] sm:$0x3] }
  0x34   :  { %v107_v41 = vrot.slane %v98_v39, %v106_v37  ;;  %v103_v42 = vrot.slane %v98_v39, %v102_v38  ;;  %v485_v7 = vld [vmem:[%s752_s4] ss:$0 sm:$0xff]  ;;  %s659_s4 = scalar_lea.vmem %s473_s13, 512 }
  0x35   :  { %p660_p1 = scmp.ne.s32.totalorder %s473_s13, %s659_s4  ;;  %p665_p3 = scmp.lt.s32.totalorder %s659_s4, %s659_s4 }
  0x36   :  { %209 = vmatpush1.bf16.msra.mxu0 %v568_v8  ;;  %525 = vmatpush3.bf16.msra.mxu1 %v588_v19 }
  0x37   :  { %210 = vmatprep.subr.bf16.mxu0 %v569_v9  ;;  %526 = vmatprep.subr.bf16.mxu1 %v589_v21  ;;  %p666_p4 = por %p665_p3, %p664_p2 }
  0x39   :  { %p667_p5 = pnand %p666_p4, %p660_p1 }
  0x3a   :  { %211 = vmatpush1.bf16.msra.mxu0 %v571_v10  ;;  %527 = vmatpush3.bf16.msra.mxu1 %v590_v23 }
  0x3b   :  { %212 = vmatprep.subr.bf16.mxu0 %v572_v12  ;;  %528 = vmatprep.subr.bf16.mxu1 %v591_v24 }
  0x3e   :  { %213 = vmatpush1.bf16.msra.mxu0 %v574_v17  ;;  %529 = vmatpush3.bf16.msra.mxu1 %v592_v26 }
  0x3f   :  { %214 = vmatprep.subr.bf16.mxu0 %v575_v18  ;;  %530 = vmatprep.subr.bf16.mxu1 %v593_v29 }
  0x42   :  { %215 = vmatpush1.bf16.msra.mxu0 %v577_v20  ;;  %531 = vmatpush3.bf16.msra.mxu1 %v594_v30 }
  0x43   :  { %216 = vmatprep.subr.bf16.mxu0 %v578_v22  ;;  %532 = vmatprep.subr.bf16.mxu1 %v595_v31 }
  0x46   :  { %217 = vmatpush1.bf16.msra.mxu0 %v580_v25  ;;  %533 = vmatpush3.bf16.msra.mxu1 %v596_v32 }
  0x47   :  { %534 = vmatprep.subr.bf16.mxu1 %v597_v33 }
  0x49   :  { %235 = vmatmul.mubr.bf16.vlgmr.msra.gmra.mxu0 %v581_v27 }
  0x4a   :  { %244 = vmatprep.mubr.bf16.mxu0 %v692_v0  ;;  %535 = vmatpush3.bf16.msra.mxu1 %v598_v34 }
  0x51   :  { %245 = vmatmul.mubr.bf16.gmra.mxu0 %v582_v28 }
 0x109   :  { %v236_v40 = vpop.f32.mrf.mxu0 }
 0x10a   :  { %v237_v47 = vadd.f32 %v236_v40, %v103_v42 }
 0x10b   :  { %v238_v43 = vpop.f32.mrf.mxu0 }
 0x10c   :  { %v239_v45 = vadd.f32 %v238_v43, %v107_v41  ;;  %v255_v54 = vmax.f32 %v237_v47, 0.0 }
 0x10d   :  { %v240_v44 = vpop.f32.mrf.mxu0 }
 0x10e   :  { %v241_v46 = vadd.f32 %v240_v44, %v103_v42  ;;  %v256_v52 = vmax.f32 %v239_v45, 0.0 }
 0x10f   :  { %v242_v48 = vpop.f32.mrf.mxu0 }
 0x110   :  { %v243_v49 = vadd.f32 %v242_v48, %v107_v41  ;;  %v257_v50 = vmax.f32 %v241_v46, 0.0 }
 0x111   :  { %v246_v51 = vpop.f32.mrf.mxu0 }
 0x112   :  { %v258_v53 = vmax.f32 %v243_v49, 0.0  ;;  %v267_v57 = vpack.c.bf16 %v257_v50, %v255_v54  ;;  %v247_v61 = vadd.f32 %v246_v51, %v103_v42 }
 0x113   :  { %v248_v55 = vpop.f32.mrf.mxu0 }
 0x114   :  { %v268_v56 = vpack.c.bf16 %v258_v53, %v256_v52  ;;  %v249_v59 = vadd.f32 %v248_v55, %v107_v41  ;;  %v259_v3 = vmax.f32 %v247_v61, 0.0 }
 0x115   :  { %v250_v58 = vpop.f32.mrf.mxu0 }
 0x116   :  { %v251_v60 = vadd.f32 %v250_v58, %v103_v42  ;;  %431 = vmatprep.mubr.bf16.mxu1 %v268_v56  ;;  %v260_v1 = vmax.f32 %v249_v59, 0.0 }
 0x117   :  { %v252_v62 = vpop.f32.mrf.mxu0  ;;  %432 = vmatmul.mubr.bf16.vlgmr.msra.gmra.mxu1 %v267_v57 }
 0x118   :  { %v253_v63 = vadd.f32 %v252_v62, %v107_v41  ;;  %v261_v0 = vmax.f32 %v251_v60, 0.0 }
 0x11a   :  { %v262_v2 = vmax.f32 %v253_v63, 0.0  ;;  %v269_v5 = vpack.c.bf16 %v261_v0, %v259_v3 }
 0x11c   :  { %v270_v4 = vpack.c.bf16 %v262_v2, %v260_v1 }
 0x11e   :  { %439 = vmatprep.mubr.bf16.mxu1 %v270_v4 }
 0x11f   :  { %440 = vmatmul.mubr.bf16.gmra.mxu1 %v269_v5 }
 0x1d7   :  { %v536_v6 = vpop.f32.mrf.mxu1 }
 0x1d9   :  { %v537_v8 = vpop.f32.mrf.mxu1 }
 0x1da   :  { %v538_v9 = vadd.f32 %v537_v8, %v536_v6 }
 0x1db   :  { %v539_v10 = vpop.f32.mrf.mxu1 }
 0x1dc   :  { %v448_v11 = vadd.f32 %v538_v9, %v485_v7 }
 0x1dd   :  { %v540_v12 = vpop.f32.mrf.mxu1 }
 0x1de   :  { %463 = vst [vmem:[#allocation9] sm:$0xff] %v448_v11  ;;  %v541_v13 = vadd.f32 %v540_v12, %v539_v10 }
 0x1df   :  { %v542_v14 = vpop.f32.mrf.mxu1 }
 0x1e0   :  { %v449_v15 = vadd.f32 %v541_v13, %v485_v7 }
 0x1e1   :  { %v543_v16 = vpop.f32.mrf.mxu1 }
 0x1e2   :  { %464 = vst [vmem:[#allocation9 + $0x8] sm:$0xff] %v449_v15  ;;  %v544_v17 = vadd.f32 %v543_v16, %v542_v14 }
 0x1e3   :  { %v545_v18 = vpop.f32.mrf.mxu1 }
 0x1e4   :  { %v450_v19 = vadd.f32 %v544_v17, %v485_v7 }
 0x1e5   :  { %v546_v20 = vpop.f32.mrf.mxu1 }
 0x1e6   :  { %465 = vst [vmem:[#allocation9 + $0x10] sm:$0xff] %v450_v19  ;;  %v547_v21 = vadd.f32 %v546_v20, %v545_v18 }
 0x1e8   :  { %v451_v22 = vadd.f32 %v547_v21, %v485_v7 }
 0x1ea   :  { %466 = vst [vmem:[#allocation9 + $0x18] sm:$0xff] %v451_v22 }
 0x1eb   :  { %670 = shalt.err (!%p667_p5)
}
 0x1ec   :  { %478 = dma.vmem_to_hbm [thread:$0]  %s473_s13, 512, %s753_s5, [#allocation5], %s686_s21, %s686_s21, %s687_s22  }
 0x1ed   :  { %683 = dma.done.wait [#allocation5], 512  }
 0x1ee   :  { %684 = vsyncadd [#allocation5], 4294966784 }
 0x1ef   :  { %482 = vsyncpa [#allocation4], 1 }
 0x1f0   :  { %483 = vsyncpa [#allocation7], 1 }
 0x1f1   :  { %484 = vsyncpa [#allocation5], 1 }

</bundles_post_ra>
